<compile_context>
chip_gen: v7x
topology: tpu7x:2x2x1
jax: 0.10.0
libtpu: 0.0.40
codegen_flags: <defaults>
</compile_context>

<pallas_src>
from functools import partial

import jax
import jax.numpy as jnp
from jax import lax
from jax.experimental import pallas as pl
from jax.experimental.pallas import tpu as pltpu

_LANE = 128
_SUBLANE = 8
_MAX_BLOCK_ROWS = 2048   # (2048,128) f32 block = 1 MiB; 2 inputs x 2 buffers = 4 MiB VMEM
_NUM_CORES = 2           # leading "parallel" grid axis (feeds both v7x TensorCores)


def _l1_partial_kernel(a_ref, b_ref, out_ref, *, rows, block_rows, blocks_per_core):
    core = pl.program_id(0)
    step = pl.program_id(1)

    # Zero this core's resident partial-sum block on its first reduction step.
    @pl.when(step == 0)
    def _():
        out_ref[...] = jnp.zeros_like(out_ref)

    # Virtual (unclamped) block index. The input index_map clamps the DMA so it
    # never walks past the last block; any rows past `rows` (partial last block,
    # or a duplicated/clamped block on the second core) are masked to zero here.
    vblock = core * blocks_per_core + step
    row0 = vblock * block_rows
    row_id = row0 + lax.broadcasted_iota(jnp.int32, (block_rows, _LANE), 0)

    a = a_ref[...].astype(jnp.float32)
    b = b_ref[...].astype(jnp.float32)
    diff = jnp.where(row_id < rows, jnp.abs(a - b), 0.0)

    # Reduce (block_rows, 128) -> (8, 128): contiguous groups of 8 rows are one
    # f32 vreg each, so this is pure VPU adds into a single-vreg accumulator.
    # The only cross-lane (XLU) reduction happens once, in the wrapper.
    out_ref[...] += diff.reshape(-1, _SUBLANE, _LANE).sum(axis=0)


def fixed_loss_est_gray_forward(est_noise, gt_noise):
    """loss = mean(|est_noise - gt_noise|)  (L1Loss with 'mean' reduction)."""
    assert est_noise.shape == gt_noise.shape
    n_elem = est_noise.size

    flat_a = est_noise.reshape(-1)
    flat_b = gt_noise.reshape(-1)

    # Lane-aligned prefix goes through the kernel; the (<128-element) tail is
    # summed in plain JAX -- avoids re-materializing full padded copies in HBM.
    n_main = (n_elem // _LANE) * _LANE
    tail = n_elem - n_main

    tail_sum = jnp.float32(0.0)
    if tail:  # static (shape-derived) branch
        tail_sum = jnp.sum(
            jnp.abs(flat_a[n_main:].astype(jnp.float32)
                    - flat_b[n_main:].astype(jnp.float32)))

    if n_main == 0:
        return tail_sum / jnp.float32(n_elem)

    if tail:
        # TODO(synk): this slice copies the lane-aligned prefix once; only hit
        # when the element count is not a multiple of 128 (zero-copy otherwise).
        flat_a = flat_a[:n_main]
        flat_b = flat_b[:n_main]

    rows = n_main // _LANE
    a2 = flat_a.reshape(rows, _LANE)
    b2 = flat_b.reshape(rows, _LANE)

    # Sub-32-bit dtypes pack along sublanes -> keep block rows 16/32-aligned.
    itemsize = jnp.dtype(est_noise.dtype).itemsize
    align = {4: _SUBLANE, 2: 2 * _SUBLANE}.get(itemsize, 4 * _SUBLANE)
    block_rows = min(_MAX_BLOCK_ROWS, pl.cdiv(rows, align) * align)
    num_blocks = pl.cdiv(rows, block_rows)
    blocks_per_core = pl.cdiv(num_blocks, _NUM_CORES)

    def in_map(c, i):
        # Clamp so the generated DMA stays in bounds; the kernel masks any
        # duplicated / out-of-range rows to zero.
        return (jnp.minimum(c * blocks_per_core + i, num_blocks - 1), 0)

    partials = pl.pallas_call(
        partial(_l1_partial_kernel, rows=rows, block_rows=block_rows,
                blocks_per_core=blocks_per_core),
        out_shape=jax.ShapeDtypeStruct((_NUM_CORES * _SUBLANE, _LANE), jnp.float32),
        grid_spec=pltpu.PrefetchScalarGridSpec(
            num_scalar_prefetch=0,
            grid=(_NUM_CORES, blocks_per_core),
            in_specs=[
                pl.BlockSpec((block_rows, _LANE), in_map),
                pl.BlockSpec((block_rows, _LANE), in_map),
            ],
            out_specs=pl.BlockSpec((_SUBLANE, _LANE), lambda c, i: (c, 0)),
        ),
        compiler_params=pltpu.CompilerParams(
            dimension_semantics=("parallel", "arbitrary"),
            vmem_limit_bytes=32 * 1024 * 1024,
        ),
    )(a2, b2)

    # Single cross-lane reduction over the tiny per-core partial-sum slab.
    return (jnp.sum(partials) + tail_sum) / jnp.float32(n_elem)


if __name__ == "__main__":
    # NCHW inputs, like the PyTorch module would receive.
    key = jax.random.PRNGKey(0)
    k1, k2 = jax.random.split(key)
    shape = (2, 4, 16, 16)
    est_noise = jax.random.normal(k1, shape, dtype=jnp.float32)
    gt_noise = jax.random.normal(k2, shape, dtype=jnp.float32)

    loss = fixed_loss_est_gray_forward(est_noise, gt_noise)
    loss = jax.block_until_ready(loss)

    # Reference check (pure JAX, same as nn.L1Loss(reduction='mean')).
    ref = jnp.mean(jnp.abs(est_noise - gt_noise))
    assert jnp.allclose(loss, ref, rtol=1e-5, atol=1e-6), (loss, ref)

    print("KERNEL_OK")
</pallas_src>

<mosaic_0001>
module attributes {stable_mosaic.version = 11 : i64} {
  func.func @_l1_partial_kernel(%arg0: i32, %arg1: i32, %arg2: memref<16x128xf32, #tpu.memory_space<vmem>>, %arg3: memref<16x128xf32, #tpu.memory_space<vmem>>, %arg4: memref<8x128xf32, #tpu.memory_space<vmem>>) attributes {dimension_semantics = [#tpu.dimension_semantics<parallel>, #tpu.dimension_semantics<arbitrary>], iteration_bounds = array<i64: 2, 1>, scalar_prefetch = 0 : i64, scratch_operands = 0 : i64, tpu.core_type = #tpu.core_type<tc>, window_params = [{transform_indices = @transform_0, window_bounds = array<i64: 16, 128>}, {transform_indices = @transform_1, window_bounds = array<i64: 16, 128>}, {transform_indices = @transform_2, window_bounds = array<i64: 8, 128>}]} {
    %c0_i32 = arith.constant 0 : i32
    %0 = arith.cmpi eq, %arg1, %c0_i32 : i32
    %1 = arith.extui %0 : i1 to i32
    %c0_i32_0 = arith.constant 0 : i32
    %2 = arith.cmpi ne, %1, %c0_i32_0 : i32
    scf.if %2 {
      %cst_10 = arith.constant 0.000000e+00 : f32
      %22 = vector.broadcast %cst_10 : f32 to vector<8x128xf32>
      %c0_11 = arith.constant 0 : index
      %c0_12 = arith.constant 0 : index
      %23 = vector.load %arg4[%c0_11, %c0_12] : memref<8x128xf32, #tpu.memory_space<vmem>>, vector<8x128xf32>
      tpu.vector_store %arg4[%c0_11, %c0_12], %22 {strides = array<i32>} : memref<8x128xf32, #tpu.memory_space<vmem>>, vector<8x128xf32>,
    } else {
    }
    %c1_i32 = arith.constant 1 : i32
    %3 = arith.muli %arg0, %c1_i32 : i32
    %4 = arith.addi %3, %arg1 : i32
    %c16_i32 = arith.constant 16 : i32
    %5 = arith.muli %4, %c16_i32 : i32
    %6 = tpu.iota {dimensions = array<i32: 0>} : vector<16x128xi32>
    %7 = vector.broadcast %5 : i32 to vector<16x128xi32>
    %8 = arith.addi %7, %6 : vector<16x128xi32>
    %c0 = arith.constant 0 : index
    %c0_1 = arith.constant 0 : index
    %9 = vector.load %arg2[%c0, %c0_1] : memref<16x128xf32, #tpu.memory_space<vmem>>, vector<16x128xf32>
    %c0_2 = arith.constant 0 : index
    %c0_3 = arith.constant 0 : index
    %10 = vector.load %arg3[%c0_2, %c0_3] : memref<16x128xf32, #tpu.memory_space<vmem>>, vector<16x128xf32>
    %c16_i32_4 = arith.constant 16 : i32
    %11 = vector.broadcast %c16_i32_4 : i32 to vector<16x128xi32>
    %12 = arith.cmpi slt, %8, %11 : vector<16x128xi32>
    %13 = arith.subf %9, %10 : vector<16x128xf32>
    %14 = math.absf %13 : vector<16x128xf32>
    %cst = arith.constant 0.000000e+00 : f32
    %15 = vector.broadcast %cst : f32 to vector<16x128xf32>
    %16 = arith.select %12, %14, %15 : vector<16x128xi1>, vector<16x128xf32>
    %c0_5 = arith.constant 0 : index
    %c0_6 = arith.constant 0 : index
    %17 = vector.load %arg4[%c0_5, %c0_6] : memref<8x128xf32, #tpu.memory_space<vmem>>, vector<8x128xf32>
    %18 = vector.shape_cast %16 : vector<16x128xf32> to vector<2x8x128xf32>
    %cst_7 = arith.constant dense<0.000000e+00> : vector<8x128xf32>
    %19 = vector.multi_reduction <add>, %18, %cst_7 [0] : vector<2x8x128xf32> to vector<8x128xf32>
    %20 = arith.addf %17, %19 : vector<8x128xf32>
    %c0_8 = arith.constant 0 : index
    %c0_9 = arith.constant 0 : index
    %21 = vector.load %arg4[%c0_8, %c0_9] : memref<8x128xf32, #tpu.memory_space<vmem>>, vector<8x128xf32>
    tpu.vector_store %arg4[%c0_8, %c0_9], %20 {strides = array<i32>} : memref<8x128xf32, #tpu.memory_space<vmem>>, vector<8x128xf32>,
    return
  }
  func.func @transform_0(%arg0: i32, %arg1: i32) -> (i32, i32) {
    %c1_i32 = arith.constant 1 : i32
    %0 = arith.muli %arg0, %c1_i32 : i32
    %1 = arith.addi %0, %arg1 : i32
    %c0_i32 = arith.constant 0 : i32
    %2 = arith.minsi %1, %c0_i32 : i32
    %c0_i32_0 = arith.constant 0 : i32
    %c0_i32_1 = arith.constant 0 : i32
    return %2, %c0_i32_0 : i32, i32
  }
  func.func @transform_1(%arg0: i32, %arg1: i32) -> (i32, i32) {
    %c1_i32 = arith.constant 1 : i32
    %0 = arith.muli %arg0, %c1_i32 : i32
    %1 = arith.addi %0, %arg1 : i32
    %c0_i32 = arith.constant 0 : i32
    %2 = arith.minsi %1, %c0_i32 : i32
    %c0_i32_0 = arith.constant 0 : i32
    %c0_i32_1 = arith.constant 0 : i32
    return %2, %c0_i32_0 : i32, i32
  }
  func.func @transform_2(%arg0: i32, %arg1: i32) -> (i32, i32) {
    %c0_i32 = arith.constant 0 : i32
    %c0_i32_0 = arith.constant 0 : i32
    return %arg0, %c0_i32 : i32, i32
  }
}

</mosaic_0001>

<bundles_post_ra>
// kernel: tpu_custom_call.1
= control target key start
LH: loop header
LB: loop body
LE: loop exit
PB: predicated region body
PF: predicated region fallthrough
CT: control target
= control target key end

     0   :  { %7 = vsyncpa [#allocation3], 0  ;;  %s892_s0 = inlined_call_operand.hbm [shape: f32[16,128], index: 0, kind: input, shape index: {}]   ;;  %s893_s1 = inlined_call_operand.hbm [shape: f32[16,128], index: 1, kind: input, shape index: {}]   ;;  %s894_s2 = inlined_call_operand.hbm [shape: f32[16,128], index: 2, kind: output, shape index: {}]  }
   0x1   :  { %9 = vsyncpa [#allocation3 + $0x1], 0 }
   0x2   :  { %10 = vsyncpa [#allocation6], 0 }
   0x3   :  { %12 = vsyncpa [#allocation6 + $0x1], 0 }
   0x4   :  { %13 = vsyncpa [#allocation4], 0 }
   0x5   :  { %15 = vsyncpa [#allocation4 + $0x1], 0  ;;  %s688_s9 = smov 0   ;;  %s690_s10 = smov 0  }
   0x6   :  { %s692_s11 = smov 0   ;;  %s694_s12 = smov 0  }
   0x7   :  { %s696_s13 = smov 0   ;;  %s698_s14 = smov 0  }
   0x8   :  { %s700_s15 = smov 0   ;;  %s702_s16 = smov 0  }
   0x9 LB: > { %s384_s17 = sadd.s32 4294967295, %s666_s16   ;;  %s385_s18 = sadd.s32 4294967294, %s666_s16   ;;  %s666_s16 = sphi %s702_s16, %s21_s16   ;;  %s662_s15 = sphi %s700_s15, %s913_s15   ;;  %s658_s14 = sphi %s698_s14, %s912_s14   ;;  %s654_s13 = sphi %s696_s13, %s882_s13   ;;  %s650_s12 = sphi %s694_s12, %s911_s12   ;;  %s646_s11 = sphi %s692_s11, %s910_s11   ;;  %s642_s10 = sphi %s690_s10, %s909_s10   ;;  %s638_s9 = sphi %s688_s9, %s908_s9  }
   0xa   : > { %s33_s19 = sadd.s32 1, %s662_s15  ;;  %p635_p1 = scmp.ne.s32.totalorder %s654_s13, 0 }
   0xb   : > { %p35_p0 = scmp.ge.s32.totalorder %s33_s19, 2  ;;  %p54_p2 = scmp.eq.s32.totalorder %s666_s16, 0 }
   0xc   : > { %p59_p3 = scmp.ne.s32.totalorder %s654_s13, %s650_s12  ;;  %p60_p5 = scmp.eq.s32.totalorder %s384_s17, 0 }
   0xd   : > { %s915_s19 = smov (%p35_p0, %s33_s19), 0  ;;  %p734_p4 = por %p635_p1, %p54_p2 }
   0xe   : > { %p738_p6 = por %p60_p5, %p59_p3  ;;  %s101_s22 = ssub.s32 %s662_s15, %s915_s19 }
   0xf   : > { %p102_p7 = scmp.eq.s32.totalorder %s101_s22, 0  ;;  %s104_s23 = sadd.s32 1, %s646_s11 }
  0x10   : > { %s898_s21 = scalar_select %p738_p6, 1, 0 }
  0x11   : > { %s746_s24 = scalar_select %p102_p7, %s646_s11, %s104_s23  }
  0x12   : > { %p114_p8 = scmp.ne.s32.totalorder %s646_s11, %s642_s10  ;;  %p115_p9 = scmp.eq.s32.totalorder %s384_s17, 1 }
  0x13   : > { %p120_p10 = scmp.ne.s32.totalorder %s642_s10, %s638_s9  ;;  %p121_p11 = scmp.eq.s32.totalorder %s385_s18, 1 }
  0x14   : > { %p752_p12 = por %p115_p9, %p114_p8  ;;  %p422_p1 = scmp.lt.s32.totalorder %s666_s16, 2 }
  0x15   : > { %p757_p0 = por %p121_p11, %p120_p10  ;;  %s668_s27 = smov [#allocation2]  }
  0x16   : > { %s899_s25 = scalar_select %p752_p12, 1, 0 }
  0x17   : > { %s900_s26 = scalar_select %p757_p0, 1, 0 }
  0x18   : > { %s155_s28 = sshll.u32 %s668_s27, 4  ;;  %p764_p2 = pnand %p422_p1, %p734_p4  ;;  %s156_s28 = int_to_ptr.vmem [resolvable:$true] %s155_s28 }
  0x19   : > { %s499_s4 = scalar_lea.hbm %s892_s0, 256 }
  0x1a   : > { %p500_p3 = scmp.ne.s32.totalorder %s892_s0, %s499_s4  ;;  %p501_p5 = pneg %p764_p2 }
  0x1b   : > { %p506_p8 = scmp.lt.u32.totalorder %s499_s4, %s499_s4  ;;  %p508_p9 = scmp.lt.u32.totalorder %s499_s4, %s892_s0 }
  0x1c   : > { %p502_p7 = pnand %p501_p5, %p500_p3 }
  0x1d   : > { %p509_p10 = por %p508_p9, %p506_p8 }
  0x1e   : > { %p503_p4 = pneg %p502_p7 }
  0x20   : > { %p510_p11 = pnand %p509_p10, %p503_p4 }
  0x22   : > { %513 = shalt.err (!%p510_p11)
}
  0x23   : > { %s514_s12 = scalar_lea.vmem %s156_s28, 256  ;;  %s521_s17 = scalar_lea.vmem %s156_s28, 512 }
  0x24   : > { %p515_p1 = scmp.ne.s32.totalorder %s156_s28, %s514_s12  ;;  %p522_p12 = scmp.lt.s32.totalorder %s156_s28, %s156_s28 }
  0x25   : > { %p523_p6 = scmp.lt.s32.totalorder %s521_s17, %s514_s12 }
  0x26   : > { %p517_p13 = pnand %p515_p1, %p501_p5 }
  0x27   : > { %p524_p3 = por %p523_p6, %p522_p12 }
  0x28   : > { %p518_p0 = pneg %p517_p13 }
  0x2a   : > { %p525_p7 = pnand %p524_p3, %p518_p0 }
  0x2c   : > { %528 = shalt.err (!%p525_p7)
}
  0x2d   : > { %s669_s18 = smov 128   ;;  %s670_s20 = smov 8  }
  0x2e   : > { %414 = dma.hbm_to_vmem [thread:$0]  (!%p764_p2), %s892_s0, 256, %s156_s28, [#allocation3], %s669_s18, %s669_s18, %s670_s20  }
  0x2f   : > { %p394_p13 = scmp.ge.s32.totalorder %s666_s16, 1  ;;  %p187_p4 = scmp.lt.s32.totalorder %s666_s16, 3 }
  0x30   : > { %s671_s30 = smov [#allocation5]   ;;  %s529_s6 = scalar_lea.hbm %s893_s1, 256 }
  0x31   : > { %p795_p8 = pnand %p394_p13, %p187_p4  ;;  %s179_s3 = sshll.u32 %s671_s30, 4  ;;  %s180_s3 = int_to_ptr.vmem [resolvable:$true] %s179_s3 }
  0x32   : > { %p530_p6 = scmp.ne.s32.totalorder %s893_s1, %s529_s6  ;;  %p536_p9 = scmp.lt.u32.totalorder %s529_s6, %s529_s6 }
  0x33   : > { %s902_s27 = scalar_select %p795_p8, 1, 0 }
  0x34   : > { %p532_p12 = pnand %p530_p6, %p501_p5  ;;  %p538_p10 = scmp.lt.u32.totalorder %s529_s6, %s893_s1 }
  0x36   : > { %p533_p0 = pneg %p532_p12  ;;  %p539_p11 = por %p538_p10, %p536_p9 }
  0x38   : > { %p540_p1 = pnand %p539_p11, %p533_p0 }
  0x3a   : > { %543 = shalt.err (!%p540_p1)
}
  0x3b   : > { %s544_s17 = scalar_lea.vmem %s180_s3, 256  ;;  %s551_s22 = scalar_lea.vmem %s180_s3, 512 }
  0x3c   : > { %p545_p3 = scmp.ne.s32.totalorder %s180_s3, %s544_s17  ;;  %p552_p4 = scmp.lt.s32.totalorder %s180_s3, %s180_s3 }
  0x3d   : > { %p553_p8 = scmp.lt.s32.totalorder %s551_s22, %s544_s17 }
  0x3e   : > { %p547_p7 = pnand %p545_p3, %p501_p5 }
  0x3f   : > { %p554_p6 = por %p553_p8, %p552_p4 }
  0x40   : > { %p548_p13 = pneg %p547_p7 }
  0x42   : > { %p555_p12 = pnand %p554_p6, %p548_p13 }
  0x44   : > { %558 = shalt.err (!%p555_p12)
}
  0x45   : > { %417 = dma.hbm_to_vmem [thread:$0]  (!%p764_p2), %s893_s1, 256, %s180_s3, [#allocation6], %s669_s18, %s669_s18, %s670_s20  }
  0x46   : > { %p903_p0 = scmp.ne.s32.totalorder %s902_s27, 0 }
  0x47   : > { %s193_s4 = sand.u32 (!%p903_p0), 1, %s654_s13   ;;  %p904_p5 = scmp.ne.s32.totalorder (!%p903_p0), %s898_s21, 0 }
  0x48   : > { %191 = sbr.rel (%p903_p0) target bundleno = 110 (0x6e), region = 28  ;;  %s395_s5 = sshll.u32 (!%p903_p0), %s193_s4, 4 }
  0x49   : > { %s194_s6 = scalar_lea.sflag (!%p903_p0), [#allocation3], %s193_s4  ;;  %s197_s7 = scalar_lea.vmem (!%p903_p0), [#allocation2], %s395_s5 }
  0x4f   : > { %624 = dma.done.wait (%p904_p5), %s194_s6, 256  }
  0x50   : > { %626 = vsyncadd (%p904_p5), %s194_s6, 4294967040  ;;  %s203_s29 = scalar_lea.sflag [#allocation6], %s193_s4  ;;  %s206_s8 = scalar_lea.vmem [#allocation5], %s395_s5 }
  0x51   : > { %628 = dma.done.wait (%p904_p5), %s203_s29, 256  }
  0x52   : > { %630 = vsyncadd (%p904_p5), %s203_s29, 4294967040  ;;  %s398_s18 = sshll.u32 %s658_s14, 4  ;;  %v247_v0 = vlaneseq  ;;  %s229_s20 = sand.u32 1, %s642_s10   ;;  %v253_v6 = vld [vmem:[%s197_s7] sm:$0xff]  ;;  %v254_v7 = vld [vmem:[%s197_s7 + $0x8] sm:$0xff] }
  0x53   : > { %v250_v2 = vstv %s398_s18  ;;  %s397_s27 = sshll.u32 %s229_s20, 3  ;;  %v255_v8 = vld [vmem:[%s206_s8] sm:$0xff]  ;;  %v256_v9 = vld [vmem:[%s206_s8 + $0x8] sm:$0xff]  ;;  %s400_s21 = sshll.u32 %s658_s14, 7 }
  0x54   : > { %v248_v1 = vshrl.u32 %v247_v0, 7  ;;  %v259_v10 = vsub.f32 %v253_v6, %v255_v8  ;;  %v260_v11 = vsub.f32 %v254_v7, %v256_v9  ;;  %s231_s3 = scalar_lea.vmem [#allocation7], %s397_s27  ;;  %s839_s22 = scalar_lea.hbm %s894_s2, %s400_s21 }
  0x55   : > { %s283_s28 = sshll.u32 %s231_s3, 4  ;;  %s270_s23 = scalar_lea.sflag [#allocation4], %s229_s20  ;;  %s841_s28 = int_to_ptr.vmem [resolvable:$true] %s283_s28 }
  0x56   : > { %v249_v3 = vadd.s32 8, %v248_v1  ;;  %v251_v4 = vadd.s32 %v250_v2, %v248_v1  ;;  %v261_v12 = vand.u32 2147483647, %v259_v10  ;;  %v262_v13 = vand.u32 2147483647, %v260_v11  ;;  %s559_s30 = scalar_lea.vmem %s841_s28, 128 }
  0x57   : > { %p560_p2 = scmp.ne.s32.totalorder %s841_s28, %s559_s30  ;;  %p905_p8 = scmp.ne.s32.totalorder %s899_s25, 0 }
  0x58   : > { %v252_v5 = vadd.s32 %v250_v2, %v249_v3  ;;  %vm257_vm0 = vcmp.lt.s32.totalorder %v251_v4, 16  ;;  %s672_s14 = smov [#allocation7]  }
  0x59   : > { %v263_v14 = vsel %vm257_vm0, %v261_v12, 0.0  ;;  %p561_p9 = pnand %p560_p2, %p905_p8  ;;  %s563_s4 = sshll.u32 %s672_s14, 4  ;;  %s564_s4 = int_to_ptr.vmem [resolvable:$false] %s563_s4 }
  0x5a   : > { %vm258_vm1 = vcmp.lt.s32.totalorder %v252_v5, 16  ;;  %s565_s5 = scalar_lea.vmem %s564_s4, 256  ;;  %p566_p11 = scmp.lt.s32.totalorder %s841_s28, %s564_s4 }
  0x5b   : > { %v264_v15 = vsel %vm258_vm1, %v262_v13, 0.0  ;;  %p562_p10 = pneg %p561_p9  ;;  %p567_p1 = scmp.lt.s32.totalorder %s565_s5, %s559_s30 }
  0x5c   : > { %v266_v16 = vadd.f32 %v264_v15, %v263_v14 }
  0x5d   : > { %p568_p3 = por %p567_p1, %p566_p11 }
  0x5e   : > { %268 = vst [vmem:[%s231_s3] sm:$0xff] %v266_v16 }
  0x5f   : > { %p569_p7 = pnand %p568_p3, %p562_p10 }
  0x61   : > { %572 = shalt.err (!%p569_p7)
}
  0x62   : > { %s573_s6 = scalar_lea.hbm %s839_s22, 128  ;;  %s577_s8 = scalar_lea.hbm %s894_s2, 256 }
  0x63   : > { %p574_p13 = scmp.ne.s32.totalorder %s839_s22, %s573_s6  ;;  %p578_p12 = scmp.lt.u32.totalorder %s839_s22, %s894_s2 }
  0x64   : > { %p579_p0 = scmp.lt.u32.totalorder %s577_s8, %s573_s6  ;;  %p581_p2 = scmp.lt.u32.totalorder %s573_s6, %s839_s22 }
  0x65   : > { %p575_p4 = pnand %p574_p13, %p905_p8 }
  0x66   : > { %p580_p5 = por %p579_p0, %p578_p12 }
  0x67   : > { %p576_p6 = pneg %p575_p4 }
  0x68   : > { %p582_p9 = por %p581_p2, %p580_p5 }
  0x6a   : > { %p583_p10 = pnand %p582_p9, %p576_p6 }
  0x6c   : > { %586 = shalt.err (!%p583_p10)
}
  0x6d   : > { %409 = dma.vmem_to_hbm [thread:$0]  (%p905_p8), %s841_s28, 128, %s839_s22, %s270_s23  }
  0x6e PF: > { %s295_s27 = sand.u32 1, %s638_s9   ;;  %p906_p11 = scmp.ne.s32.totalorder %s900_s26, 0 }
  0x6f   : > { %p907_p1 = scmp.ge.s32.totalorder %s666_s16, 2  ;;  %s296_s21 = scalar_lea.sflag [#allocation4], %s295_s27 }
  0x71   : > { %p419_p3 = pnand %p907_p1, %p906_p11 }
  0x73   : > { %632 = dma.done.wait (!%p419_p3), %s296_s21, 128  }
  0x74   : > { %634 = vsyncadd (!%p419_p3), %s296_s21, 4294967168  ;;  %s21_s16 = sadd.s32 1, %s666_s16   ;;  %s908_s9 = smov %s642_s10 }
  0x75   : > { %p18_p7 = scmp.ge.s32.totalorder %s21_s16, 4   ;;  %s909_s10 = smov %s646_s11 }
  0x76   : > { %s910_s11 = smov %s746_s24  ;;  %s911_s12 = smov %s654_s13 }
  0x77   : > { %s882_s13 = smov 0   ;;  %s912_s14 = smov %s662_s15 }
  0x78   : > { %s913_s15 = smov %s915_s19  ;;  %20 = sbr.rel (!%p18_p7) target bundleno = 9 (0x9), region = 90 }
  0x7f   :  { %301 = vsyncpa [#allocation3], 1 }
  0x80   :  { %303 = vsyncpa [#allocation3 + $0x1], 1 }
  0x81   :  { %304 = vsyncpa [#allocation6], 1 }
  0x82   :  { %306 = vsyncpa [#allocation6 + $0x1], 1 }
  0x83   :  { %307 = vsyncpa [#allocation4], 1 }
  0x84   :  { %309 = vsyncpa [#allocation4 + $0x1], 1 }

</bundles_post_ra>
